<compile_context>
chip_gen: v6e
topology: v6e:2x2x1
jax: 0.10.0
libtpu: 0.0.40
codegen_flags: <defaults>
</compile_context>

<pallas_src>
import functools

import jax
import jax.numpy as jnp
from jax.experimental import pallas as pl
from jax.experimental.pallas import tpu as pltpu


def _reeig_rectify_kernel(epsilon, v_ref, d_ref, out_ref):
    """out = V @ diag(max(D, eps)) @ V^T for a (TB, n, n) tile of matrices."""
    v = v_ref[...]                                  # (TB, n, n) eigenvectors (columns)
    d = d_ref[...]                                  # (TB, n)    eigenvalues
    d_rect = jnp.maximum(d, epsilon)                # torch.clamp(D, min=epsilon)
    scaled = v * d_rect[:, None, :]                 # V @ diag_embed(D): scale columns of V
    # (V * D_rect) @ V^T, batched over the tile; contraction over eigen index k.
    out_ref[...] = jnp.einsum(
        "bik,bjk->bij", scaled, v, preferred_element_type=jnp.float32)


def reeig(X, epsilon=1e-4, tile_b=8):
    """ReEig forward for X of shape (n, n) or (B, n, n), symmetric float32."""
    squeeze = X.ndim == 2
    if squeeze:
        X = X[None]
    X = X.astype(jnp.float32)
    B, n, _ = X.shape

    # TODO(synk): torch.linalg.eigh has no clean Pallas equivalent (iterative,
    # data-dependent eigensolver); the batched eigendecomposition runs in XLA.
    D, V = jnp.linalg.eigh(X)                       # D: (B, n), V: (B, n, n)

    tb = min(tile_b, B)
    pad = (-B) % tb
    if pad:
        V = jnp.pad(V, ((0, pad), (0, 0), (0, 0)))
        D = jnp.pad(D, ((0, pad), (0, 0)))
    Bp = B + pad

    flops = 2 * Bp * n * n * n + Bp * n * n         # batched matmul + column scaling
    bytes_accessed = 4 * (2 * Bp * n * n + Bp * n)  # V in, out, D in (f32)

    out = pl.pallas_call(
        functools.partial(_reeig_rectify_kernel, float(epsilon)),
        out_shape=jax.ShapeDtypeStruct((Bp, n, n), jnp.float32),
        grid_spec=pltpu.PrefetchScalarGridSpec(
            num_scalar_prefetch=0,
            grid=(Bp // tb,),
            in_specs=[
                pl.BlockSpec((tb, n, n), lambda i: (i, 0, 0)),   # V tile
                pl.BlockSpec((tb, n), lambda i: (i, 0)),         # D tile
            ],
            out_specs=pl.BlockSpec((tb, n, n), lambda i: (i, 0, 0)),
        ),
        compiler_params=pltpu.CompilerParams(
            dimension_semantics=("parallel",)),
        cost_estimate=pl.CostEstimate(
            flops=flops, transcendentals=0, bytes_accessed=bytes_accessed),
    )(V, D)

    out = out[:B]
    return out[0] if squeeze else out


if __name__ == "__main__":
    key = jax.random.PRNGKey(0)
    batch, n = 16, 16
    A = jax.random.normal(key, (batch, n, n), jnp.float32)
    X = 0.5 * (A + jnp.swapaxes(A, -1, -2))   # symmetric, indefinite -> clamp is exercised

    eps = 1e-4
    out = reeig(X, epsilon=eps, tile_b=8)
    jax.block_until_ready(out)
    assert out.shape == X.shape

    # Pure-JAX reference of the same forward pass.
    D, V = jnp.linalg.eigh(X)
    ref = jnp.einsum("bik,bk,bjk->bij", V, jnp.maximum(D, eps), V)
    err = float(jnp.max(jnp.abs(out - ref)))
    # Loose tolerance: kernel MXU f32 matmul vs. XLA default matmul precision.
    assert err < 5e-2, f"max abs error {err}"
    print("KERNEL_OK")
</pallas_src>

<mosaic_0001>
module attributes {stable_mosaic.version = 11 : i64} {
  func.func @_reeig_rectify_kernel(%arg0: i32, %arg1: memref<8x16x16xf32, #tpu.memory_space<vmem>>, %arg2: memref<8x16xf32, #tpu.memory_space<vmem>>, %arg3: memref<8x16x16xf32, #tpu.memory_space<vmem>>) attributes {dimension_semantics = [#tpu.dimension_semantics<parallel>], iteration_bounds = array<i64: 2>, scalar_prefetch = 0 : i64, scratch_operands = 0 : i64, tpu.core_type = #tpu.core_type<tc>, window_params = [{transform_indices = @transform_0, window_bounds = array<i64: 8, 16, 16>}, {transform_indices = @transform_1, window_bounds = array<i64: 8, 16>}, {transform_indices = @transform_2, window_bounds = array<i64: 8, 16, 16>}]} {
    %c0 = arith.constant 0 : index
    %c0_0 = arith.constant 0 : index
    %c0_1 = arith.constant 0 : index
    %0 = vector.load %arg1[%c0, %c0_0, %c0_1] : memref<8x16x16xf32, #tpu.memory_space<vmem>>, vector<8x16x16xf32>
    %c0_2 = arith.constant 0 : index
    %c0_3 = arith.constant 0 : index
    %1 = vector.load %arg2[%c0_2, %c0_3] : memref<8x16xf32, #tpu.memory_space<vmem>>, vector<8x16xf32>
    %cst = arith.constant 9.99999974E-5 : f32
    %2 = vector.broadcast %cst : f32 to vector<8x16xf32>
    %3 = arith.maximumf %1, %2 : vector<8x16xf32>
    %4 = vector.shape_cast %3 : vector<8x16xf32> to vector<8x1x16xf32>
    %5 = vector.broadcast %4 : vector<8x1x16xf32> to vector<8x16x16xf32>
    %6 = arith.mulf %0, %5 : vector<8x16x16xf32>
    "tpu.trace_start"() <{level = 10 : i32, message = "bik,bjk->bij"}> : () -> ()
    %cst_4 = arith.constant dense<0.000000e+00> : vector<8x16x16xf32>
    %7 = tpu.matmul %6, %0, %cst_4 {dimension_numbers = #tpu.dot_dimension_numbers<[2], [2], [1], [1], [0, 0, 0, 1, 1, 1], [0], [0]>} : vector<8x16x16xf32>, vector<8x16x16xf32>, vector<8x16x16xf32> -> vector<8x16x16xf32>
    "tpu.trace_stop"() : () -> ()
    %c0_5 = arith.constant 0 : index
    %c0_6 = arith.constant 0 : index
    %c0_7 = arith.constant 0 : index
    %8 = vector.load %arg3[%c0_5, %c0_6, %c0_7] : memref<8x16x16xf32, #tpu.memory_space<vmem>>, vector<8x16x16xf32>
    tpu.vector_store %arg3[%c0_5, %c0_6, %c0_7], %7 {strides = array<i32>} : memref<8x16x16xf32, #tpu.memory_space<vmem>>, vector<8x16x16xf32>,
    return
  }
  func.func @transform_0(%arg0: i32) -> (i32, i32, i32) {
    %c0_i32 = arith.constant 0 : i32
    %c0_i32_0 = arith.constant 0 : i32
    %c0_i32_1 = arith.constant 0 : i32
    return %arg0, %c0_i32, %c0_i32_0 : i32, i32, i32
  }
  func.func @transform_1(%arg0: i32) -> (i32, i32) {
    %c0_i32 = arith.constant 0 : i32
    %c0_i32_0 = arith.constant 0 : i32
    return %arg0, %c0_i32 : i32, i32
  }
  func.func @transform_2(%arg0: i32) -> (i32, i32, i32) {
    %c0_i32 = arith.constant 0 : i32
    %c0_i32_0 = arith.constant 0 : i32
    %c0_i32_1 = arith.constant 0 : i32
    return %arg0, %c0_i32, %c0_i32_0 : i32, i32, i32
  }
}

</mosaic_0001>

<bundles_post_ra>
// kernel: tpu_custom_call.1
= control target key start
LH: loop header
LB: loop body
LE: loop exit
PB: predicated region body
PF: predicated region fallthrough
CT: control target
= control target key end

     0   :  { %7 = vsyncpa [#allocation3], 0  ;;  %s1808_s0 = inlined_call_operand.hbm [shape: f32[16,16,16], index: 0, kind: input, shape index: {}]   ;;  %s1809_s1 = inlined_call_operand.hbm [shape: f32[16,16], index: 1, kind: input, shape index: {}]   ;;  %s1810_s2 = inlined_call_operand.hbm [shape: f32[16,16,16], index: 2, kind: output, shape index: {}]  }
   0x1   :  { %9 = vsyncpa [#allocation3 + $0x1], 0 }
   0x2   :  { %10 = vsyncpa [#allocation6], 0 }
   0x3   :  { %12 = vsyncpa [#allocation6 + $0x1], 0 }
   0x4   :  { %13 = vsyncpa [#allocation4], 0 }
   0x5   :  { %15 = vsyncpa [#allocation4 + $0x1], 0  ;;  %s1498_s9 = smov 0   ;;  %s1500_s10 = smov 0  }
   0x6   :  { %s1502_s11 = smov 0   ;;  %s1504_s12 = smov 0  }
   0x7 LB: > { %s1519_s13 = sadd.s32 4294967295, %s1473_s12   ;;  %s1150_s14 = sadd.s32 4294967294, %s1473_s12   ;;  %s1473_s12 = sphi %s1504_s12, %s1827_s12   ;;  %s1469_s11 = sphi %s1502_s11, %s1826_s11   ;;  %s1465_s10 = sphi %s1500_s10, %s1825_s10   ;;  %s1461_s9 = sphi %s1498_s9, %s1824_s9  }
   0x8   : > { %s1523_s15 = sadd.s32 1, %s1473_s12   ;;  %s28_s16 = sadd.s32 1, %s1469_s11 }
   0x9   : > { %s25_s17 = ssub.s32 %s1473_s12, %s1523_s15  ;;  %p35_p0 = scmp.ne.s32.totalorder %s1469_s11, %s1465_s10 }
   0xa   : > { %p26_p1 = scmp.eq.s32.totalorder %s25_s17, 0  ;;  %p36_p2 = scmp.eq.s32.totalorder %s1473_s12, 0 }
   0xb   : > { %p41_p3 = scmp.ne.s32.totalorder %s1465_s10, %s1461_s9  ;;  %p42_p4 = scmp.eq.s32.totalorder %s1519_s13, 0 }
   0xc   : > { %s1535_s18 = scalar_select %p26_p1, %s1469_s11, %s28_s16  }
   0xd   : > { %p1537_p5 = por %p36_p2, %p35_p0  ;;  %p1541_p6 = por %p42_p4, %p41_p3 }
   0xe   : > { %p91_p7 = scmp.eq.s32.totalorder %s1519_s13, 1  ;;  %p97_p8 = scmp.eq.s32.totalorder %s1150_s14, 1 }
   0xf   : > { %s1814_s20 = scalar_select %p1541_p6, 1, 0 }
  0x10   : > { %p1310_p10 = scmp.lt.s32.totalorder %s1473_s12, 2  ;;  %p1548_p11 = por %p91_p7, %p35_p0 }
  0x11   : > { %p1552_p12 = por %p97_p8, %p41_p3  ;;  %s1557_s23 = sand.u32 1, %s1469_s11  }
  0x12   : > { %s1815_s21 = scalar_select %p1548_p11, 1, 0 }
  0x13   : > { %s1816_s22 = scalar_select %p1552_p12, 1, 0 }
  0x14   : > { %s1202_s24 = sshll.u32 %s1473_s12, 11  ;;  %s1153_s25 = sshll.u32 %s1557_s23, 7 }
  0x15   : > { %s1564_s28 = scalar_lea.hbm %s1808_s0, %s1202_s24  ;;  %s121_s29 = scalar_lea.vmem [#allocation2], %s1153_s25 }
  0x16   : > { %s129_s30 = sshll.u32 %s121_s29, 4  ;;  %p1568_p13 = pnand %p1310_p10, %p1537_p5  ;;  %s1572_s30 = int_to_ptr.vmem [resolvable:$true] %s129_s30 }
  0x17   : > { %s118_s4 = scalar_lea.sflag [#allocation3], %s1557_s23  ;;  %s1349_s5 = scalar_lea.hbm %s1564_s28, 2048 }
  0x18   : > { %p1350_p0 = scmp.ne.s32.totalorder %s1564_s28, %s1349_s5  ;;  %p1351_p1 = pneg %p1568_p13 }
  0x19   : > { %s1354_s8 = scalar_lea.hbm %s1808_s0, 4096  ;;  %p1355_p4 = scmp.lt.s32.totalorder %s1564_s28, %s1808_s0 }
  0x1a   : > { %p1352_p2 = pnand %p1351_p1, %p1350_p0  ;;  %p1356_p5 = scmp.lt.s32.totalorder %s1354_s8, %s1349_s5 }
  0x1c   : > { %p1353_p3 = pneg %p1352_p2  ;;  %p1357_p7 = por %p1356_p5, %p1355_p4 }
  0x1e   : > { %p1358_p8 = pnand %p1357_p7, %p1353_p3 }
  0x20   : > { %1361 = shalt.err (!%p1358_p8)
}
  0x21   : > { %s1362_s17 = scalar_lea.vmem %s1572_s30, 2048  ;;  %s1475_s19 = smov [#allocation2]  }
  0x22   : > { %p1363_p10 = scmp.ne.s32.totalorder %s1572_s30, %s1362_s17  ;;  %s1367_s24 = sshll.u32 %s1475_s19, 4  ;;  %s1368_s24 = int_to_ptr.vmem [resolvable:$false] %s1367_s24 }
  0x23   : > { %s1369_s25 = scalar_lea.vmem %s1368_s24, 4096  ;;  %p1370_p9 = scmp.lt.s32.totalorder %s1572_s30, %s1368_s24 }
  0x24   : > { %p1365_p0 = pnand %p1363_p10, %p1351_p1  ;;  %p1371_p12 = scmp.lt.s32.totalorder %s1369_s25, %s1362_s17 }
  0x26   : > { %p1366_p2 = pneg %p1365_p0  ;;  %p1372_p11 = por %p1371_p12, %p1370_p9 }
  0x28   : > { %p1373_p4 = pnand %p1372_p11, %p1366_p2 }
  0x2a   : > { %1376 = shalt.err (!%p1373_p4)
}
  0x2b   : > { %s1476_s26 = smov 128   ;;  %s1477_s27 = smov 8  }
  0x2c   : > { %1302 = dma.hbm_to_vmem [thread:$0]  (!%p1568_p13), %s1564_s28, 2048, %s1572_s30, %s118_s4, %s1476_s26, %s1476_s26, %s1477_s27  }
  0x2d   : > { %p1159_p3 = scmp.ge.s32.totalorder %s1473_s12, 1  ;;  %p155_p5 = scmp.lt.s32.totalorder %s1473_s12, 3 }
  0x2e   : > { %s1157_s29 = sshll.u32 %s1557_s23, 3  ;;  %s1158_s6 = sshll.u32 %s1473_s12, 7 }
  0x2f   : > { %p1604_p9 = pnand %p1159_p3, %p155_p5  ;;  %s143_s7 = scalar_lea.vmem [#allocation5], %s1157_s29 }
  0x30   : > { %s150_s8 = sshll.u32 %s143_s7, 4  ;;  %s148_s17 = scalar_lea.hbm %s1809_s1, %s1158_s6  ;;  %s151_s8 = int_to_ptr.vmem [resolvable:$true] %s150_s8 }
  0x31   : > { %s1818_s5 = scalar_select %p1604_p9, 1, 0 }
  0x32   : > { %s140_s19 = scalar_lea.sflag [#allocation6], %s1557_s23  ;;  %s1377_s24 = scalar_lea.hbm %s148_s17, 128 }
  0x33   : > { %p1378_p11 = scmp.ne.s32.totalorder %s148_s17, %s1377_s24  ;;  %s1382_s4 = scalar_lea.hbm %s1809_s1, 256 }
  0x34   : > { %p1383_p8 = scmp.lt.s32.totalorder %s148_s17, %s1809_s1  ;;  %p1384_p10 = scmp.lt.s32.totalorder %s1382_s4, %s1377_s24 }
  0x35   : > { %p1380_p12 = pnand %p1378_p11, %p1351_p1 }
  0x36   : > { %p1385_p0 = por %p1384_p10, %p1383_p8 }
  0x37   : > { %p1381_p7 = pneg %p1380_p12 }
  0x39   : > { %p1386_p2 = pnand %p1385_p0, %p1381_p7 }
  0x3b   : > { %1389 = shalt.err (!%p1386_p2)
}
  0x3c   : > { %s1390_s27 = scalar_lea.vmem %s151_s8, 128  ;;  %s1478_s23 = smov [#allocation5]  }
  0x3d   : > { %p1391_p4 = scmp.ne.s32.totalorder %s151_s8, %s1390_s27  ;;  %s1395_s29 = sshll.u32 %s1478_s23, 4  ;;  %s1396_s29 = int_to_ptr.vmem [resolvable:$false] %s1395_s29 }
  0x3e   : > { %s1397_s6 = scalar_lea.vmem %s1396_s29, 256  ;;  %p1398_p11 = scmp.lt.s32.totalorder %s151_s8, %s1396_s29 }
  0x3f   : > { %p1393_p3 = pnand %p1391_p4, %p1351_p1  ;;  %p1399_p12 = scmp.lt.s32.totalorder %s1397_s6, %s1390_s27 }
  0x41   : > { %p1394_p5 = pneg %p1393_p3  ;;  %p1400_p6 = por %p1399_p12, %p1398_p11 }
  0x43   : > { %p1401_p9 = pnand %p1400_p6, %p1394_p5 }
  0x45   : > { %1404 = shalt.err (!%p1401_p9)
}
  0x46   : > { %1305 = dma.hbm_to_vmem [thread:$0]  (!%p1568_p13), %s148_s17, 128, %s151_s8, %s140_s19  }
  0x47   : > { %p1819_p7 = scmp.ne.s32.totalorder %s1818_s5, 0 }
  0x48   : > { %s1630_s7 = sand.u32 (!%p1819_p7), 1, %s1465_s10   ;;  %p1820_p6 = scmp.ne.s32.totalorder (!%p1819_p7), %s1814_s20, 0 }
  0x49   : > { %159 = sbr.rel (%p1819_p7) target bundleno = 334 (0x14e), region = 28  ;;  %s1160_s14 = sshll.u32 (!%p1819_p7), %s1630_s7, 7 }
  0x4a   : > { %s162_s16 = scalar_lea.sflag (!%p1819_p7), [#allocation3], %s1630_s7  ;;  %s1636_s24 = scalar_lea.vmem (!%p1819_p7), [#allocation2], %s1160_s14 }
  0x4e   : > { %1448 = dma.done.wait (%p1820_p6), %s162_s16, 2048  }
  0x4f   : > { %1450 = vsyncadd (%p1820_p6), %s162_s16, 4294965248  ;;  %s1161_s3 = sshll.u32 %s1630_s7, 3  ;;  %s171_s5 = scalar_lea.sflag [#allocation6], %s1630_s7 }
  0x50   : > { %s174_s8 = scalar_lea.vmem [#allocation5], %s1161_s3 }
  0x51   : > { %1452 = dma.done.wait (%p1820_p6), %s171_s5, 128  }
  0x52   : > { %1454 = vsyncadd (%p1820_p6), %s171_s5, 4294967168  ;;  %v225_v0 = vlaneseq  ;;  %v1479_v1 = vmov 1966171168   ;;  %vm326_vm0 = vcmask 130048   ;;  %v203_v5 = vld [vmem:[%s1636_s24 + $0x8] sm:$0xff]  ;;  %v205_v6 = vld [vmem:[%s1636_s24 + $0x18] sm:$0xff] }
  0x53   : > { %v223_v2 = vunpack.c.l.s4 %v1479_v1  ;;  %v202_v7 = vld [vmem:[%s1636_s24] sm:$0xff]  ;;  %1237 = vmatprep.subr.msk.mxu0 %vm326_vm0, %v203_v5  ;;  %1244 = vmatprep.subr.msk.mxu1 %vm326_vm0, %v205_v6  ;;  %v204_v9 = vld [vmem:[%s1636_s24 + $0x10] sm:$0xff]  ;;  %v207_v15 = vld [vmem:[%s1636_s24 + $0x28] sm:$0xff]  ;;  %s1724_s20 = scalar_lea.vmem [#allocation7], %s1160_s14  ;;  %s1204_s17 = sshll.u32 %s1519_s13, 11 }
  0x54   : > { %v226_v4 = vshrl.u32 %v225_v0, 7  ;;  %v218_v10 = vld [vmem:[%s174_s8] sm:$0xff]  ;;  %1238 = vmatpush3.xpose.msk.msra.mxu0 %vm326_vm0, %v203_v5  ;;  %1245 = vmatpush3.xpose.msk.msra.mxu1 %vm326_vm0, %v205_v6  ;;  %v209_v16 = vld [vmem:[%s1636_s24 + $0x38] sm:$0xff]  ;;  %v208_v30 = vld [vmem:[%s1636_s24 + $0x30] sm:$0xff]  ;;  %s1054_s19 = sshll.u32 %s1724_s20, 4  ;;  %s1759_s4 = scalar_lea.hbm %s1810_s2, %s1204_s17  ;;  %s1761_s19 = int_to_ptr.vmem [resolvable:$true] %s1054_s19 }
  0x55   : > { %v224_v3 = vunpack.c.0.s8 %v223_v2  ;;  %v219_v11 = vmax.f32 %v218_v10, 0.0001  ;;  %1239 = vmatprep.subr.msk.mxu0 %vm326_vm0, %v202_v7  ;;  %1246 = vmatprep.subr.msk.mxu1 %vm326_vm0, %v204_v9  ;;  %v206_v29 = vld [vmem:[%s1636_s24 + $0x20] sm:$0xff]  ;;  %v211_v39 = vld [vmem:[%s1636_s24 + $0x48] sm:$0xff]  ;;  %v212_v43 = vld [vmem:[%s1636_s24 + $0x50] sm:$0xff]  ;;  %s1040_s13 = scalar_lea.sflag [#allocation4], %s1630_s7 }
  0x56   : > { %v1658_v14 = vsub.s32 0, %v226_v4  ;;  %v210_v42 = vld [vmem:[%s1636_s24 + $0x40] sm:$0xff]  ;;  %v213_v44 = vld [vmem:[%s1636_s24 + $0x58] sm:$0xff]  ;;  %v215_v51 = vld [vmem:[%s1636_s24 + $0x68] sm:$0xff]  ;;  %s1405_s25 = scalar_lea.vmem %s1761_s19, 2048  ;;  %p1821_p1 = scmp.ne.s32.totalorder %s1815_s21, 0 }
  0x57   : > { %v227_v8 = vsub.s32 %v224_v3, %v226_v4  ;;  %v221_v12 = vcombine.high %v219_v11, %v219_v11  ;;  %v214_v52 = vld [vmem:[%s1636_s24 + $0x60] sm:$0xff]  ;;  %v216_v55 = vld [vmem:[%s1636_s24 + $0x70] sm:$0xff]  ;;  %v217_v56 = vld [vmem:[%s1636_s24 + $0x78] sm:$0xff]  ;;  %p1406_p13 = scmp.ne.s32.totalorder %s1761_s19, %s1405_s25  ;;  %s1480_s26 = smov [#allocation7]  }
  0x58   : > { %1240 = vmatpush3.xpose.msk.msra.mxu0 %vm326_vm0, %v202_v7  ;;  %1247 = vmatpush3.xpose.msk.msra.mxu1 %vm326_vm0, %v204_v9  ;;  %s1409_s27 = sshll.u32 %s1480_s26, 4  ;;  %s1410_s27 = int_to_ptr.vmem [resolvable:$false] %s1409_s27 }
  0x59   : > { %v228_v13 = vrot.slane %v219_v11, %v227_v8  ;;  %v235_v19 = vrot.slane %v221_v12, %v227_v8  ;;  %1251 = vmatprep.subr.msk.mxu0 %vm326_vm0, %v207_v15  ;;  %1258 = vmatprep.subr.msk.mxu1 %vm326_vm0, %v209_v16  ;;  %p1407_p9 = pnand %p1406_p13, %p1821_p1  ;;  %s1411_s23 = scalar_lea.vmem %s1410_s27, 4096 }
  0x5a   : > { %p1412_p10 = scmp.lt.s32.totalorder %s1761_s19, %s1410_s27  ;;  %p1413_p0 = scmp.lt.s32.totalorder %s1411_s23, %s1405_s25 }
  0x5b   : > { %v244_v17 = vrot.slane %v228_v13, %v227_v8  ;;  %v236_v18 = vcombine.high %v228_v13, %v228_v13  ;;  %v237_v23 = vcombine.high %v235_v19, %v235_v19  ;;  %v251_v31 = vrot.slane %v235_v19, %v227_v8  ;;  %p1408_p8 = pneg %p1407_p9 }
  0x5c   : > { %p1414_p2 = por %p1413_p0, %p1412_p10 }
  0x5d   : > { %v266_v20 = vcombine.high %v244_v17, %v244_v17  ;;  %v273_v21 = vrot.slane %v244_v17, %v1658_v14  ;;  %v258_v22 = vrot.slane %v236_v18, %v227_v8  ;;  %v265_v36 = vrot.slane %v237_v23, %v227_v8 }
  0x5e   : > { %v289_v38 = vrot.slane %v251_v31, %v1658_v14  ;;  %v267_v46 = vcombine.high %v251_v31, %v251_v31  ;;  %p1415_p4 = pnand %p1414_p2, %p1408_p8 }
  0x5f   : > { %v310_v24 = vmul.f32 %v273_v21, %v202_v7  ;;  %v311_v25 = vmul.f32 %v273_v21, %v203_v5  ;;  %v281_v26 = vrot.slane %v266_v20, %v1658_v14  ;;  %v268_v27 = vcombine.high %v258_v22, %v258_v22 }
  0x60   : > { %v277_v28 = vrot.slane %v258_v22, %v1658_v14  ;;  %v293_v41 = vrot.slane %v265_v36, %v1658_v14  ;;  %v318_v45 = vmul.f32 %v289_v38, %v210_v42  ;;  %v269_v49 = vcombine.high %v265_v36, %v265_v36 }
  0x61   : > { %1241 = vmatprep.mubr.msk.f32.mxu0 %vm326_vm0, %v310_v24  ;;  %v285_v32 = vrot.slane %v268_v27, %v1658_v14  ;;  %v314_v33 = vmul.f32 %v281_v26, %v206_v29  ;;  %v315_v40 = vmul.f32 %v281_v26, %v207_v15  ;;  %v297_v50 = vrot.slane %v267_v46, %v1658_v14 }
  0x62   : > { %1242 = vmatmul.mubr.msk.f32.vlgmr.msra.gmra.mxu0 %vm326_vm0, %v311_v25  ;;  %v312_v34 = vmul.f32 %v277_v28, %v204_v9  ;;  %v313_v35 = vmul.f32 %v277_v28, %v205_v6  ;;  %v320_v48 = vmul.f32 %v293_v41, %v212_v43  ;;  %v319_v53 = vmul.f32 %v289_v38, %v211_v39 }
  0x63   : > { %1252 = vmatpush3.xpose.msk.msra.mxu0 %vm326_vm0, %v207_v15  ;;  %v316_v37 = vmul.f32 %v285_v32, %v208_v30  ;;  %1255 = vmatprep.mubr.msk.f32.mxu0 %vm326_vm0, %v314_v33  ;;  %v317_v47 = vmul.f32 %v285_v32, %v209_v16  ;;  %v301_v54 = vrot.slane %v269_v49, %v1658_v14 }
  0x64   : > { %1248 = vmatprep.mubr.msk.f32.mxu1 %vm326_vm0, %v312_v34  ;;  %1253 = vmatprep.subr.msk.mxu0 %vm326_vm0, %v206_v29  ;;  %v322_v57 = vmul.f32 %v297_v50, %v214_v52  ;;  %v321_v58 = vmul.f32 %v293_v41, %v213_v44  ;;  %v323_v60 = vmul.f32 %v297_v50, %v215_v51 }
  0x65   : > { %1249 = vmatmul.mubr.msk.f32.vlgmr.msra.gmra.mxu1 %vm326_vm0, %v313_v35  ;;  %v324_v59 = vmul.f32 %v301_v54, %v216_v55  ;;  %v325_v61 = vmul.f32 %v301_v54, %v217_v56 }
  0x66   : > { %1259 = vmatpush3.xpose.msk.msra.mxu1 %vm326_vm0, %v209_v16  ;;  %1262 = vmatprep.mubr.msk.f32.mxu1 %vm326_vm0, %v316_v37 }
  0x67   : > { %1254 = vmatpush3.xpose.msk.msra.mxu0 %vm326_vm0, %v206_v29  ;;  %1260 = vmatprep.subr.msk.mxu1 %vm326_vm0, %v208_v30 }
  0x68   : > { %1265 = vmatprep.subr.msk.mxu0 %vm326_vm0, %v211_v39 }
  0x6a   : > { %1261 = vmatpush3.xpose.msk.msra.mxu1 %vm326_vm0, %v208_v30  ;;  %1256 = vmatmul.mubr.msk.f32.vlgmr.msra.gmra.mxu0 %vm326_vm0, %v315_v40 }
  0x6b   : > { %1266 = vmatpush3.xpose.msk.msra.mxu0 %vm326_vm0, %v211_v39  ;;  %1272 = vmatprep.subr.msk.mxu1 %vm326_vm0, %v213_v44 }
  0x6c   : > { %1267 = vmatprep.subr.msk.mxu0 %vm326_vm0, %v210_v42  ;;  %1269 = vmatprep.mubr.msk.f32.mxu0 %vm326_vm0, %v318_v45 }
  0x6d   : > { %1263 = vmatmul.mubr.msk.f32.vlgmr.msra.gmra.mxu1 %vm326_vm0, %v317_v47 }
  0x6e   : > { %1273 = vmatpush3.xpose.msk.msra.mxu1 %vm326_vm0, %v213_v44  ;;  %1276 = vmatprep.mubr.msk.f32.mxu1 %vm326_vm0, %v320_v48 }
  0x6f   : > { %1268 = vmatpush3.xpose.msk.msra.mxu0 %vm326_vm0, %v210_v42  ;;  %1274 = vmatprep.subr.msk.mxu1 %vm326_vm0, %v212_v43 }
  0x70   : > { %1279 = vmatprep.subr.msk.mxu0 %vm326_vm0, %v215_v51 }
  0x72   : > { %1275 = vmatpush3.xpose.msk.msra.mxu1 %vm326_vm0, %v212_v43  ;;  %1270 = vmatmul.mubr.msk.f32.vlgmr.msra.gmra.mxu0 %vm326_vm0, %v319_v53 }
  0x73   : > { %1280 = vmatpush3.xpose.msk.msra.mxu0 %vm326_vm0, %v215_v51  ;;  %1286 = vmatprep.subr.msk.mxu1 %vm326_vm0, %v217_v56 }
  0x74   : > { %1281 = vmatprep.subr.msk.mxu0 %vm326_vm0, %v214_v52  ;;  %1283 = vmatprep.mubr.msk.f32.mxu0 %vm326_vm0, %v322_v57 }
  0x75   : > { %1277 = vmatmul.mubr.msk.f32.vlgmr.msra.gmra.mxu1 %vm326_vm0, %v321_v58 }
  0x76   : > { %1287 = vmatpush3.xpose.msk.msra.mxu1 %vm326_vm0, %v217_v56  ;;  %1290 = vmatprep.mubr.msk.f32.mxu1 %vm326_vm0, %v324_v59 }
  0x77   : > { %1282 = vmatpush3.xpose.msk.msra.mxu0 %vm326_vm0, %v214_v52  ;;  %1288 = vmatprep.subr.msk.mxu1 %vm326_vm0, %v216_v55 }
  0x7a   : > { %1289 = vmatpush3.xpose.msk.msra.mxu1 %vm326_vm0, %v216_v55  ;;  %1284 = vmatmul.mubr.msk.f32.vlgmr.msra.gmra.mxu0 %vm326_vm0, %v323_v60 }
  0x7d   : > { %1291 = vmatmul.mubr.msk.f32.vlgmr.msra.gmra.mxu1 %vm326_vm0, %v325_v61 }
 0x122   : > { %v1243_v62 = vpop.f32.mrf.mxu0 }
 0x123   : > { %1024 = vst.msk [vmem:[%s1724_s20 + $0x8] sm:$0xff] %vm326_vm0, %v1243_v62 }
 0x124   : > { %v405_v63 = vpop.f32.mrf.mxu0 }
 0x125   : > { %1023 = vst.msk [vmem:[%s1724_s20] sm:$0xff] %vm326_vm0, %v405_v63  ;;  %v1250_v0 = vpop.f32.mrf.mxu1 }
 0x126   : > { %1026 = vst.msk [vmem:[%s1724_s20 + $0x18] sm:$0xff] %vm326_vm0, %v1250_v0 }
 0x127   : > { %v492_v1 = vpop.f32.mrf.mxu1 }
 0x128   : > { %1025 = vst.msk [vmem:[%s1724_s20 + $0x10] sm:$0xff] %vm326_vm0, %v492_v1 }
 0x12a   : > { %v1257_v2 = vpop.f32.mrf.mxu0 }
 0x12b   : > { %1028 = vst.msk [vmem:[%s1724_s20 + $0x28] sm:$0xff] %vm326_vm0, %v1257_v2 }
 0x12c   : > { %v579_v3 = vpop.f32.mrf.mxu0 }
 0x12d   : > { %v1264_v4 = vpop.f32.mrf.mxu1  ;;  %1027 = vst.msk [vmem:[%s1724_s20 + $0x20] sm:$0xff] %vm326_vm0, %v579_v3 }
 0x12e   : > { %1030 = vst.msk [vmem:[%s1724_s20 + $0x38] sm:$0xff] %vm326_vm0, %v1264_v4 }
 0x12f   : > { %v666_v5 = vpop.f32.mrf.mxu1 }
 0x130   : > { %1029 = vst.msk [vmem:[%s1724_s20 + $0x30] sm:$0xff] %vm326_vm0, %v666_v5 }
 0x132   : > { %v1271_v6 = vpop.f32.mrf.mxu0 }
 0x133   : > { %1032 = vst.msk [vmem:[%s1724_s20 + $0x48] sm:$0xff] %vm326_vm0, %v1271_v6 }
 0x134   : > { %v753_v7 = vpop.f32.mrf.mxu0 }
 0x135   : > { %v1278_v8 = vpop.f32.mrf.mxu1  ;;  %1031 = vst.msk [vmem:[%s1724_s20 + $0x40] sm:$0xff] %vm326_vm0, %v753_v7 }
 0x136   : > { %1034 = vst.msk [vmem:[%s1724_s20 + $0x58] sm:$0xff] %vm326_vm0, %v1278_v8 }
 0x137   : > { %v840_v9 = vpop.f32.mrf.mxu1 }
 0x138   : > { %1033 = vst.msk [vmem:[%s1724_s20 + $0x50] sm:$0xff] %vm326_vm0, %v840_v9 }
 0x13a   : > { %v1285_v10 = vpop.f32.mrf.mxu0 }
 0x13b   : > { %1036 = vst.msk [vmem:[%s1724_s20 + $0x68] sm:$0xff] %vm326_vm0, %v1285_v10 }
 0x13c   : > { %v927_v11 = vpop.f32.mrf.mxu0 }
 0x13d   : > { %1035 = vst.msk [vmem:[%s1724_s20 + $0x60] sm:$0xff] %vm326_vm0, %v927_v11  ;;  %v1292_v12 = vpop.f32.mrf.mxu1 }
 0x13e   : > { %1038 = vst.msk [vmem:[%s1724_s20 + $0x78] sm:$0xff] %vm326_vm0, %v1292_v12 }
 0x13f   : > { %v1014_v13 = vpop.f32.mrf.mxu1 }
 0x140   : > { %1037 = vst.msk [vmem:[%s1724_s20 + $0x70] sm:$0xff] %vm326_vm0, %v1014_v13 }
 0x141   : > { %1418 = shalt.err (!%p1415_p4)
}
 0x142   : > { %s1419_s29 = scalar_lea.hbm %s1759_s4, 2048  ;;  %s1423_s16 = scalar_lea.hbm %s1810_s2, 4096 }
 0x143   : > { %p1420_p3 = scmp.ne.s32.totalorder %s1759_s4, %s1419_s29  ;;  %p1424_p12 = scmp.lt.s32.totalorder %s1759_s4, %s1810_s2 }
 0x144   : > { %p1425_p7 = scmp.lt.s32.totalorder %s1423_s16, %s1419_s29 }
 0x145   : > { %p1421_p5 = pnand %p1420_p3, %p1821_p1 }
 0x146   : > { %p1426_p6 = por %p1425_p7, %p1424_p12 }
 0x147   : > { %p1422_p11 = pneg %p1421_p5 }
 0x149   : > { %p1427_p13 = pnand %p1426_p6, %p1422_p11 }
 0x14b   : > { %1430 = shalt.err (!%p1427_p13)
}
 0x14c   : > { %s1481_s5 = smov 128   ;;  %s1482_s8 = smov 8  }
 0x14d   : > { %1297 = dma.vmem_to_hbm [thread:$0]  (%p1821_p1), %s1761_s19, 2048, %s1759_s4, %s1040_s13, %s1481_s5, %s1481_s5, %s1482_s8  }
 0x14e PF: > { %s1069_s20 = sand.u32 1, %s1461_s9   ;;  %p1822_p9 = scmp.ne.s32.totalorder %s1816_s22, 0 }
 0x14f   : > { %p1823_p8 = scmp.ge.s32.totalorder %s1473_s12, 2  ;;  %s1070_s17 = scalar_lea.sflag [#allocation4], %s1069_s20 }
 0x151   : > { %p1307_p10 = pnand %p1823_p8, %p1822_p9 }
 0x153   : > { %p1308_p0 = pneg %p1307_p10 }
 0x155   : > { %1456 = dma.done.wait (%p1308_p0), %s1070_s17, 2048  }
 0x156   : > { %1458 = vsyncadd (%p1308_p0), %s1070_s17, 4294965248  ;;  %p18_p2 = scmp.ge.s32.totalorder %s1523_s15, 4   ;;  %s1824_s9 = smov %s1465_s10 }
 0x157   : > { %s1825_s10 = smov %s1469_s11  ;;  %s1826_s11 = smov %s1535_s18 }
 0x158   : > { %s1827_s12 = smov %s1523_s15  ;;  %20 = sbr.rel (!%p18_p2) target bundleno = 7 (0x7), region = 86 }
 0x15d   :  { %1075 = vsyncpa [#allocation3], 1 }
 0x15e   :  { %1077 = vsyncpa [#allocation3 + $0x1], 1 }
 0x15f   :  { %1078 = vsyncpa [#allocation6], 1 }
 0x160   :  { %1080 = vsyncpa [#allocation6 + $0x1], 1 }
 0x161   :  { %1081 = vsyncpa [#allocation4], 1 }
 0x162   :  { %1083 = vsyncpa [#allocation4 + $0x1], 1 }

</bundles_post_ra>
